<compile_context>
chip_gen: v6e
topology: v6e:2x2x1
jax: 0.10.0
libtpu: 0.0.40
codegen_flags: <defaults>
</compile_context>

<pallas_src>
import jax
import jax.numpy as jnp
from jax.experimental import pallas as pl
from jax.experimental.pallas import tpu as pltpu

LAYERS = [3, 50, 50, 50, 1]


def pinn_kernel(x_ref,
                w1_ref, b1_ref,
                w2_ref, b2_ref,
                w3_ref, b3_ref,
                w4_ref, b4_ref,
                o_ref):
    # Transposed MLP: activations are (features, tm), batch on the lane axis.
    h = x_ref[...]                                                    # (3, tm)
    h = jnp.tanh(
        jnp.dot(w1_ref[...], h, preferred_element_type=jnp.float32) + b1_ref[...])
    h = jnp.tanh(
        jnp.dot(w2_ref[...], h, preferred_element_type=jnp.float32) + b2_ref[...])
    h = jnp.tanh(
        jnp.dot(w3_ref[...], h, preferred_element_type=jnp.float32) + b3_ref[...])
    o_ref[...] = (
        jnp.dot(w4_ref[...], h, preferred_element_type=jnp.float32) + b4_ref[...])


def pinn_forward(x, y, t, params, *, tm=512):
    """x, y, t: (N, 1) float32 arrays.

    params: list of (W, b) with W in PyTorch orientation (out_features,
    in_features) and b of shape (out_features,).
    """
    N = x.shape[0]
    assert tm % 128 == 0, "batch tile must be a multiple of the 128-lane width"
    # Don't use a tile larger than the (lane-rounded) batch itself.
    tm = min(tm, pl.cdiv(N, 128) * 128)
    num_tiles = pl.cdiv(N, tm)
    n_pad = num_tiles * tm

    # (3, N) with batch on the last (lane) axis; zero-pad the batch tail.
    inputs_t = jnp.concatenate([x, y, t], axis=1).T
    if n_pad != N:
        inputs_t = jnp.pad(inputs_t, ((0, 0), (0, n_pad - N)))

    flat_params = []
    # Activation stream is tiled along lanes; weights/biases use constant
    # index maps (full-array blocks) so they stay resident across grid steps.
    in_specs = [pl.BlockSpec((LAYERS[0], tm), lambda i: (0, i))]
    for (w, b) in params:
        flat_params.append(w)                                         # (out, in)
        flat_params.append(b.reshape(-1, 1))                          # (out, 1)
        in_specs.append(pl.BlockSpec(w.shape, lambda i: (0, 0)))
        in_specs.append(pl.BlockSpec((b.shape[0], 1), lambda i: (0, 0)))

    out = pl.pallas_call(
        pinn_kernel,
        out_shape=jax.ShapeDtypeStruct((1, n_pad), jnp.float32),
        grid_spec=pltpu.PrefetchScalarGridSpec(
            num_scalar_prefetch=0,
            grid=(num_tiles,),
            in_specs=in_specs,
            out_specs=pl.BlockSpec((1, tm), lambda i: (0, i)),
        ),
        compiler_params=pltpu.CompilerParams(
            dimension_semantics=("parallel",)),
    )(inputs_t, *flat_params)

    # Layout plumbing only: drop padding, return PyTorch-shaped (N, 1).
    return out[0, :N].reshape(N, 1)


def init_params(key, layers):
    """Deterministic init mimicking nn.Linear's uniform(-1/sqrt(fan_in), ...).

    Weights kept in PyTorch orientation (out_features, in_features)."""
    params = []
    for i in range(len(layers) - 1):
        fan_in, fan_out = layers[i], layers[i + 1]
        key, kw, kb = jax.random.split(key, 3)
        bound = 1.0 / (fan_in ** 0.5)
        w = jax.random.uniform(kw, (fan_out, fan_in), jnp.float32, -bound, bound)
        b = jax.random.uniform(kb, (fan_out,), jnp.float32, -bound, bound)
        params.append((w, b))
    return params


def reference_forward(x, y, t, params):
    h = jnp.concatenate([x, y, t], axis=1)
    for (w, b) in params[:-1]:
        h = jnp.tanh(h @ w.T + b)
    w, b = params[-1]
    return h @ w.T + b


if __name__ == "__main__":
    key = jax.random.PRNGKey(0)
    k_params, kx, ky, kt = jax.random.split(key, 4)

    params = init_params(k_params, LAYERS)

    # Small batch of collocation points; deliberately not a multiple of the
    # batch tile so the cdiv + padding path is exercised, and >1 grid step so
    # both TensorCores get work on v7x.
    N = 1000
    x = jax.random.uniform(kx, (N, 1), jnp.float32)
    y = jax.random.uniform(ky, (N, 1), jnp.float32)
    t = jax.random.uniform(kt, (N, 1), jnp.float32)

    out = pinn_forward(x, y, t, params)
    out = jax.block_until_ready(out)

    ref = reference_forward(x, y, t, params)
    assert out.shape == (N, 1)
    max_err = float(jnp.max(jnp.abs(out - ref)))
    assert jnp.allclose(out, ref, atol=5e-4, rtol=5e-4), max_err

    print("KERNEL_OK")
</pallas_src>

<mosaic_0001>
module attributes {stable_mosaic.version = 11 : i64} {
  func.func @pinn_kernel(%arg0: i32, %arg1: memref<3x512xf32, #tpu.memory_space<vmem>>, %arg2: memref<50x3xf32, #tpu.memory_space<vmem>>, %arg3: memref<50x1xf32, #tpu.memory_space<vmem>>, %arg4: memref<50x50xf32, #tpu.memory_space<vmem>>, %arg5: memref<50x1xf32, #tpu.memory_space<vmem>>, %arg6: memref<50x50xf32, #tpu.memory_space<vmem>>, %arg7: memref<50x1xf32, #tpu.memory_space<vmem>>, %arg8: memref<1x50xf32, #tpu.memory_space<vmem>>, %arg9: memref<1x1xf32, #tpu.memory_space<vmem>>, %arg10: memref<1x512xf32, #tpu.memory_space<vmem>>) attributes {dimension_semantics = [#tpu.dimension_semantics<parallel>], iteration_bounds = array<i64: 2>, scalar_prefetch = 0 : i64, scratch_operands = 0 : i64, tpu.core_type = #tpu.core_type<tc>, window_params = [{transform_indices = @transform_0, window_bounds = array<i64: 3, 512>}, {pipeline_mode = #tpu.pipeline_mode<synchronous>, transform_indices = @transform_1, window_bounds = array<i64: 50, 3>}, {pipeline_mode = #tpu.pipeline_mode<synchronous>, transform_indices = @transform_2, window_bounds = array<i64: 50, 1>}, {pipeline_mode = #tpu.pipeline_mode<synchronous>, transform_indices = @transform_3, window_bounds = array<i64: 50, 50>}, {pipeline_mode = #tpu.pipeline_mode<synchronous>, transform_indices = @transform_4, window_bounds = array<i64: 50, 1>}, {pipeline_mode = #tpu.pipeline_mode<synchronous>, transform_indices = @transform_5, window_bounds = array<i64: 50, 50>}, {pipeline_mode = #tpu.pipeline_mode<synchronous>, transform_indices = @transform_6, window_bounds = array<i64: 50, 1>}, {pipeline_mode = #tpu.pipeline_mode<synchronous>, transform_indices = @transform_7, window_bounds = array<i64: 1, 50>}, {pipeline_mode = #tpu.pipeline_mode<synchronous>, transform_indices = @transform_8, window_bounds = array<i64: 1, 1>}, {transform_indices = @transform_9, window_bounds = array<i64: 1, 512>}]} {
    %c0 = arith.constant 0 : index
    %c0_0 = arith.constant 0 : index
    %0 = vector.load %arg1[%c0, %c0_0] : memref<3x512xf32, #tpu.memory_space<vmem>>, vector<3x512xf32>
    %c0_1 = arith.constant 0 : index
    %c0_2 = arith.constant 0 : index
    %1 = vector.load %arg2[%c0_1, %c0_2] : memref<50x3xf32, #tpu.memory_space<vmem>>, vector<50x3xf32>
    %cst = arith.constant dense<0.000000e+00> : vector<50x512xf32>
    %2 = tpu.matmul %1, %0, %cst {dimension_numbers = #tpu.dot_dimension_numbers<[1], [0], [0], [1], [0, 0, 1, 1], [], []>} : vector<50x3xf32>, vector<3x512xf32>, vector<50x512xf32> -> vector<50x512xf32>
    %c0_3 = arith.constant 0 : index
    %c0_4 = arith.constant 0 : index
    %3 = vector.load %arg3[%c0_3, %c0_4] : memref<50x1xf32, #tpu.memory_space<vmem>>, vector<50x1xf32>
    %4 = vector.broadcast %3 : vector<50x1xf32> to vector<50x512xf32>
    %5 = arith.addf %2, %4 : vector<50x512xf32>
    %6 = math.tanh %5 : vector<50x512xf32>
    %c0_5 = arith.constant 0 : index
    %c0_6 = arith.constant 0 : index
    %7 = vector.load %arg4[%c0_5, %c0_6] : memref<50x50xf32, #tpu.memory_space<vmem>>, vector<50x50xf32>
    %cst_7 = arith.constant dense<0.000000e+00> : vector<50x512xf32>
    %8 = tpu.matmul %7, %6, %cst_7 {dimension_numbers = #tpu.dot_dimension_numbers<[1], [0], [0], [1], [0, 0, 1, 1], [], []>} : vector<50x50xf32>, vector<50x512xf32>, vector<50x512xf32> -> vector<50x512xf32>
    %c0_8 = arith.constant 0 : index
    %c0_9 = arith.constant 0 : index
    %9 = vector.load %arg5[%c0_8, %c0_9] : memref<50x1xf32, #tpu.memory_space<vmem>>, vector<50x1xf32>
    %10 = vector.broadcast %9 : vector<50x1xf32> to vector<50x512xf32>
    %11 = arith.addf %8, %10 : vector<50x512xf32>
    %12 = math.tanh %11 : vector<50x512xf32>
    %c0_10 = arith.constant 0 : index
    %c0_11 = arith.constant 0 : index
    %13 = vector.load %arg6[%c0_10, %c0_11] : memref<50x50xf32, #tpu.memory_space<vmem>>, vector<50x50xf32>
    %cst_12 = arith.constant dense<0.000000e+00> : vector<50x512xf32>
    %14 = tpu.matmul %13, %12, %cst_12 {dimension_numbers = #tpu.dot_dimension_numbers<[1], [0], [0], [1], [0, 0, 1, 1], [], []>} : vector<50x50xf32>, vector<50x512xf32>, vector<50x512xf32> -> vector<50x512xf32>
    %c0_13 = arith.constant 0 : index
    %c0_14 = arith.constant 0 : index
    %15 = vector.load %arg7[%c0_13, %c0_14] : memref<50x1xf32, #tpu.memory_space<vmem>>, vector<50x1xf32>
    %16 = vector.broadcast %15 : vector<50x1xf32> to vector<50x512xf32>
    %17 = arith.addf %14, %16 : vector<50x512xf32>
    %18 = math.tanh %17 : vector<50x512xf32>
    %c0_15 = arith.constant 0 : index
    %c0_16 = arith.constant 0 : index
    %19 = vector.load %arg8[%c0_15, %c0_16] : memref<1x50xf32, #tpu.memory_space<vmem>>, vector<1x50xf32>
    %cst_17 = arith.constant dense<0.000000e+00> : vector<1x512xf32>
    %20 = tpu.matmul %19, %18, %cst_17 {dimension_numbers = #tpu.dot_dimension_numbers<[1], [0], [0], [1], [0, 0, 1, 1], [], []>} : vector<1x50xf32>, vector<50x512xf32>, vector<1x512xf32> -> vector<1x512xf32>
    %c0_18 = arith.constant 0 : index
    %c0_19 = arith.constant 0 : index
    %21 = vector.load %arg9[%c0_18, %c0_19] : memref<1x1xf32, #tpu.memory_space<vmem>>, vector<1x1xf32>
    %22 = vector.broadcast %21 : vector<1x1xf32> to vector<1x512xf32>
    %23 = arith.addf %20, %22 : vector<1x512xf32>
    %c0_20 = arith.constant 0 : index
    %c0_21 = arith.constant 0 : index
    %24 = vector.load %arg10[%c0_20, %c0_21] : memref<1x512xf32, #tpu.memory_space<vmem>>, vector<1x512xf32>
    tpu.vector_store %arg10[%c0_20, %c0_21], %23 {strides = array<i32>} : memref<1x512xf32, #tpu.memory_space<vmem>>, vector<1x512xf32>,
    return
  }
  func.func @transform_0(%arg0: i32) -> (i32, i32) {
    %c0_i32 = arith.constant 0 : i32
    %c0_i32_0 = arith.constant 0 : i32
    return %c0_i32, %arg0 : i32, i32
  }
  func.func @transform_1(%arg0: i32) -> (i32, i32) {
    %c0_i32 = arith.constant 0 : i32
    %c0_i32_0 = arith.constant 0 : i32
    %c0_i32_1 = arith.constant 0 : i32
    return %c0_i32, %c0_i32_0 : i32, i32
  }
  func.func @transform_2(%arg0: i32) -> (i32, i32) {
    %c0_i32 = arith.constant 0 : i32
    %c0_i32_0 = arith.constant 0 : i32
    %c0_i32_1 = arith.constant 0 : i32
    return %c0_i32, %c0_i32_0 : i32, i32
  }
  func.func @transform_3(%arg0: i32) -> (i32, i32) {
    %c0_i32 = arith.constant 0 : i32
    %c0_i32_0 = arith.constant 0 : i32
    %c0_i32_1 = arith.constant 0 : i32
    return %c0_i32, %c0_i32_0 : i32, i32
  }
  func.func @transform_4(%arg0: i32) -> (i32, i32) {
    %c0_i32 = arith.constant 0 : i32
    %c0_i32_0 = arith.constant 0 : i32
    %c0_i32_1 = arith.constant 0 : i32
    return %c0_i32, %c0_i32_0 : i32, i32
  }
  func.func @transform_5(%arg0: i32) -> (i32, i32) {
    %c0_i32 = arith.constant 0 : i32
    %c0_i32_0 = arith.constant 0 : i32
    %c0_i32_1 = arith.constant 0 : i32
    return %c0_i32, %c0_i32_0 : i32, i32
  }
  func.func @transform_6(%arg0: i32) -> (i32, i32) {
    %c0_i32 = arith.constant 0 : i32
    %c0_i32_0 = arith.constant 0 : i32
    %c0_i32_1 = arith.constant 0 : i32
    return %c0_i32, %c0_i32_0 : i32, i32
  }
  func.func @transform_7(%arg0: i32) -> (i32, i32) {
    %c0_i32 = arith.constant 0 : i32
    %c0_i32_0 = arith.constant 0 : i32
    %c0_i32_1 = arith.constant 0 : i32
    return %c0_i32, %c0_i32_0 : i32, i32
  }
  func.func @transform_8(%arg0: i32) -> (i32, i32) {
    %c0_i32 = arith.constant 0 : i32
    %c0_i32_0 = arith.constant 0 : i32
    %c0_i32_1 = arith.constant 0 : i32
    return %c0_i32, %c0_i32_0 : i32, i32
  }
  func.func @transform_9(%arg0: i32) -> (i32, i32) {
    %c0_i32 = arith.constant 0 : i32
    %c0_i32_0 = arith.constant 0 : i32
    return %c0_i32, %arg0 : i32, i32
  }
}

</mosaic_0001>

<bundles_post_ra>
// kernel: tpu_custom_call.1
= control target key start
LH: loop header
LB: loop body
LE: loop exit
PB: predicated region body
PF: predicated region fallthrough
CT: control target
= control target key end

     0   :  { %s2512_s0 = inlined_call_operand.vmem [shape: f32[3,1024], index: 0, kind: input, shape index: {}]   ;;  %s2513_s1 = inlined_call_operand.vmem [shape: f32[50,3], index: 1, kind: input, shape index: {}]   ;;  %s2514_s2 = inlined_call_operand.vmem [shape: f32[50,1], index: 2, kind: input, shape index: {}]   ;;  %s2515_s3 = inlined_call_operand.vmem [shape: f32[50,50], index: 3, kind: input, shape index: {}]   ;;  %s2516_s4 = inlined_call_operand.vmem [shape: f32[50,1], index: 4, kind: input, shape index: {}]   ;;  %s2517_s5 = inlined_call_operand.vmem [shape: f32[50,50], index: 5, kind: input, shape index: {}]   ;;  %s2518_s6 = inlined_call_operand.vmem [shape: f32[50,1], index: 6, kind: input, shape index: {}]   ;;  %s2519_s7 = inlined_call_operand.vmem [shape: f32[1,50], index: 7, kind: input, shape index: {}]   ;;  %s2520_s8 = inlined_call_operand.<no memory space> [shape: f32[1,1], index: 8, kind: input, shape index: {}]   ;;  %s2521_s9 = inlined_call_operand.hbm [shape: f32[1,1024], index: 9, kind: output, shape index: {}]  }
   0x1   :  { %v14_v0 = vstv %s2520_s8 }
   0x2   :  { %15 = vst [vmem:[#allocation2] sm:$0x1] %v14_v0 }
   0x3   :  { %16 = vsyncpa [#allocation4], 0 }
   0x4   :  { %18 = vsyncpa [#allocation4 + $0x1], 0  ;;  %s1996_s11 = smov 0   ;;  %s1998_s12 = smov 0  }
   0x5   :  { %s2000_s13 = smov 0   ;;  %s2002_s14 = smov 0  }
   0x6 LB: > { %s2017_s8 = sadd.s32 4294967295, %s1937_s14   ;;  %s1590_s15 = sadd.s32 4294967294, %s1937_s14   ;;  %s1937_s14 = sphi %s2002_s14, %s2527_s14   ;;  %s1933_s13 = sphi %s2000_s13, %s2526_s13   ;;  %s1929_s12 = sphi %s1998_s12, %s2525_s12   ;;  %s1925_s11 = sphi %s1996_s11, %s2524_s11  }
   0x7   : > { %s2021_s16 = sadd.s32 1, %s1937_s14   ;;  %s225_s17 = sadd.s32 1, %s1933_s13 }
   0x8   : > { %s222_s18 = ssub.s32 %s1937_s14, %s2021_s16  ;;  %p235_p0 = scmp.ne.s32.totalorder %s1933_s13, %s1929_s12 }
   0x9   : > { %p223_p1 = scmp.eq.s32.totalorder %s222_s18, 0  ;;  %p236_p2 = scmp.eq.s32.totalorder %s2017_s8, 1 }
   0xa   : > { %p241_p3 = scmp.ne.s32.totalorder %s1929_s12, %s1925_s11  ;;  %p242_p4 = scmp.eq.s32.totalorder %s1590_s15, 1 }
   0xb   : > { %s2032_s19 = scalar_select %p223_p1, %s1933_s13, %s225_s17  }
   0xc   : > { %p2034_p5 = por %p236_p2, %p235_p0  ;;  %p2038_p6 = por %p242_p4, %p241_p3 }
   0xd   : > { %p1593_p7 = scmp.ge.s32.totalorder %s1937_s14, 1  ;;  %p293_p8 = scmp.lt.s32.totalorder %s1937_s14, 3 }
   0xf   : > { %p294_p9 = pnand %p1593_p7, %p293_p8 }
  0x10   : > { %s1595_s22 = sshll.u32 (!%p294_p9), %s2017_s8, 2  ;;  %s326_s23 = sand.u32 (!%p294_p9), 1, %s1929_s12  }
  0x11   : > { %297 = sbr.rel (%p294_p9) target bundleno = 997 (0x3e5), region = 56  ;;  %p330_p10 = scmp.lt.s32.totalorder (!%p294_p9), %s1595_s22, 7 }
  0x12   : > { %s1594_s24 = sshll.u32 (!%p294_p9), %s326_s23, 2  ;;  %s1517_s30 = scalar_lea.sflag (!%p294_p9), [#allocation4], %s326_s23 }
  0x13   : > { %s328_s25 = scalar_lea.vmem (!%p294_p9), [#allocation3], %s1594_s24  ;;  %s1942_s15 = smov (!%p294_p9), [#allocation3]  }
  0x14   : > { %s1531_s26 = sshll.u32 (!%p294_p9), %s328_s25, 4  ;;  %s1881_s17 = sshll.u32 (!%p294_p9), %s1942_s15, 4  ;;  %s1532_s26 = int_to_ptr.vmem [resolvable:$true] %s1531_s26  ;;  %s1882_s17 = int_to_ptr.vmem [resolvable:$false] %s1881_s17 }
  0x15   : > { %s1877_s10 = scalar_lea.vmem (!%p294_p9), %s1532_s26, 64  ;;  %p1884_p0 = scmp.lt.s32.totalorder (!%p294_p9), %s1532_s26, %s1882_s17 }
  0x16   : > { %v1939_v1 = vmov 0.0   ;;  %v1940_v2 = vmov 0   ;;  %v351_v3 = vld [vmem:[%s2514_s2 + $0x30] sm:$0x3]  ;;  %s2529_s22 = smov (!%p330_p10, %s1595_s22), 7  ;;  %v349_v4 = vld [vmem:[%s2514_s2 + $0x20] sm:$0xff]  ;;  %p1878_p11 = scmp.ne.s32.totalorder %s1532_s26, %s1877_s10 }
  0x17   : > { %486 = vmatprep.mubr.f32.mxu0 %v1939_v1  ;;  %593 = vmatprep.mubr.f32.mxu1 %v1939_v1  ;;  %v350_v5 = vld [vmem:[%s2514_s2 + $0x28] sm:$0xff]  ;;  %s1596_s29 = sshll.u32 %s2529_s22, 2  ;;  %v348_v6 = vld [vmem:[%s2514_s2 + $0x18] sm:$0xff]  ;;  %vm413_vm0 = vcmask 1042432   ;;  %v338_v11 = vld [vmem:[%s2513_s1] sm:$0xff]  ;;  %vm391_vm1 = vcmask 23552  }
  0x18   : > { %1705 = vset.pattern.permute.xlu0 %v1940_v2  ;;  %1706 = vset.pattern.permute.xlu1 %v1940_v2  ;;  %s333_s18 = scalar_lea.vmem %s2512_s0, %s1596_s29  ;;  %v347_v12 = vld [vmem:[%s2514_s2 + $0x10] sm:$0xff]  ;;  %v346_v13 = vld [vmem:[%s2514_s2 + $0x8] sm:$0xff]  ;;  %v345_v15 = vld [vmem:[%s2514_s2] sm:$0xff]  ;;  %vm735_vm2 = vcmask 1041408   ;;  %vm713_vm3 = vcmask 408576   ;;  %s1662_s22 = sshll.u32 %s2017_s8, 6 }
  0x19   : > { %384 = vperm.xlu0 %1705, %v351_v3   ;;  %374 = vperm.xlu1 %1706, %v349_v4   ;;  %v336_v7 = vld [vmem:[%s333_s18] sm:$0x77]  ;;  %v337_v8 = vld [vmem:[%s333_s18 + $0x8] sm:$0x77]  ;;  %v677_v16 = vld [vmem:[%s2516_s4 + $0x30] sm:$0x3]  ;;  %s1529_s29 = scalar_lea.hbm %s2521_s9, %s1662_s22  ;;  %p1879_p12 = pnand %p1878_p11, %p2034_p5 }
  0x1a   : > { %v389_v9 = vcombine.high %v336_v7, %v336_v7  ;;  %v390_v10 = vcombine.high %v337_v8, %v337_v8  ;;  %v339_v14 = vld [vmem:[%s2513_s1 + $0x8] sm:$0xff]  ;;  %v340_v17 = vld [vmem:[%s2513_s1 + $0x10] sm:$0xff]  ;;  %v675_v19 = vld [vmem:[%s2516_s4 + $0x20] sm:$0xff]  ;;  %s1883_s8 = scalar_lea.vmem %s1882_s17, 128 }
  0x1b   : > { %v676_v18 = vld [vmem:[%s2516_s4 + $0x28] sm:$0xff]  ;;  %v341_v20 = vld [vmem:[%s2513_s1 + $0x18] sm:$0xff]  ;;  %v673_v22 = vld [vmem:[%s2516_s4 + $0x10] sm:$0xff]  ;;  %p1880_p13 = pneg %p1879_p12  ;;  %p1885_p1 = scmp.lt.s32.totalorder %s1883_s8, %s1877_s10 }
  0x1c   : > { %1597 = vmatprep.subr.msk.mxu0 %vm413_vm0, %v389_v9  ;;  %1606 = vmatprep.subr.msk.mxu1 %vm413_vm0, %v390_v10  ;;  %v674_v21 = vld [vmem:[%s2516_s4 + $0x18] sm:$0xff]  ;;  %v342_v23 = vld [vmem:[%s2513_s1 + $0x20] sm:$0xff]  ;;  %v672_v24 = vld [vmem:[%s2516_s4 + $0x8] sm:$0xff] }
  0x1d   : > { %379 = vperm.xlu0 %1705, %v350_v5   ;;  %369 = vperm.xlu1 %1706, %v348_v6   ;;  %v671_v25 = vld [vmem:[%s2516_s4] sm:$0xff]  ;;  %v343_v26 = vld [vmem:[%s2513_s1 + $0x28] sm:$0xff]  ;;  %v1003_v27 = vld [vmem:[%s2518_s6 + $0x30] sm:$0x3]  ;;  %p1886_p2 = por %p1885_p1, %p1884_p0 }
  0x1e   : > { %1598 = vmatpush1.msk.msra.mxu0 %vm413_vm0, %v336_v7  ;;  %1607 = vmatpush1.msk.msra.mxu1 %vm413_vm0, %v337_v8  ;;  %v1002_v28 = vld [vmem:[%s2518_s6 + $0x28] sm:$0xff]  ;;  %v344_v29 = vld [vmem:[%s2513_s1 + $0x30] sm:$0x3]  ;;  %v1001_v30 = vld [vmem:[%s2518_s6 + $0x20] sm:$0xff] }
  0x1f   : > { %1599 = vmatmul.mubr.msk.f32.vlgmr.msra.gmra.mxu0 %vm391_vm1, %v338_v11  ;;  %1608 = vmatmul.mubr.msk.f32.vlgmr.msra.gmra.mxu1 %vm391_vm1, %v338_v11  ;;  %v1000_v31 = vld [vmem:[%s2518_s6 + $0x18] sm:$0xff]  ;;  %v999_v32 = vld [vmem:[%s2518_s6 + $0x10] sm:$0xff]  ;;  %v998_v33 = vld [vmem:[%s2518_s6 + $0x8] sm:$0xff]  ;;  %p1887_p3 = pnand %p1886_p2, %p1880_p13 }
  0x20   : > { %492 = vmatprep.mubr.f32.mxu0 %v1939_v1  ;;  %599 = vmatprep.mubr.f32.mxu1 %v1939_v1  ;;  %v997_v34 = vld [vmem:[%s2518_s6] sm:$0xff] }
  0x21   : > { %364 = vperm.xlu0 %1705, %v347_v12   ;;  %359 = vperm.xlu1 %1706, %v346_v13   ;;  %v1315_v35 = vld [vmem:[#allocation2] sm:$0x1] }
  0x23   : > { %1600 = vmatmul.mubr.msk.f32.gmra.mxu0 %vm391_vm1, %v339_v14  ;;  %1609 = vmatmul.mubr.msk.f32.gmra.mxu1 %vm391_vm1, %v339_v14 }
  0x24   : > { %498 = vmatprep.mubr.f32.mxu0 %v1939_v1  ;;  %605 = vmatprep.mubr.f32.mxu1 %v1939_v1 }
  0x25   : > { %354 = vperm.xlu0 %1705, %v345_v15   ;;  %710 = vperm.xlu1 %1706, %v677_v16  }
  0x27   : > { %1601 = vmatmul.mubr.msk.f32.gmra.mxu0 %vm391_vm1, %v340_v17  ;;  %1610 = vmatmul.mubr.msk.f32.gmra.mxu1 %vm391_vm1, %v340_v17 }
  0x28   : > { %504 = vmatprep.mubr.f32.mxu0 %v1939_v1  ;;  %611 = vmatprep.mubr.f32.mxu1 %v1939_v1 }
  0x29   : > { %705 = vperm.xlu0 %1705, %v676_v18   ;;  %700 = vperm.xlu1 %1706, %v675_v19  }
  0x2b   : > { %1602 = vmatmul.mubr.msk.f32.gmra.mxu0 %vm391_vm1, %v341_v20  ;;  %1611 = vmatmul.mubr.msk.f32.gmra.mxu1 %vm391_vm1, %v341_v20 }
  0x2c   : > { %510 = vmatprep.mubr.f32.mxu0 %v1939_v1  ;;  %617 = vmatprep.mubr.f32.mxu1 %v1939_v1 }
  0x2d   : > { %695 = vperm.xlu0 %1705, %v674_v21   ;;  %690 = vperm.xlu1 %1706, %v673_v22  }
  0x2f   : > { %1603 = vmatmul.mubr.msk.f32.gmra.mxu0 %vm391_vm1, %v342_v23  ;;  %1612 = vmatmul.mubr.msk.f32.gmra.mxu1 %vm391_vm1, %v342_v23 }
  0x30   : > { %516 = vmatprep.mubr.f32.mxu0 %v1939_v1  ;;  %623 = vmatprep.mubr.f32.mxu1 %v1939_v1 }
  0x31   : > { %685 = vperm.xlu0 %1705, %v672_v24   ;;  %680 = vperm.xlu1 %1706, %v671_v25  }
  0x33   : > { %1604 = vmatmul.mubr.msk.f32.gmra.mxu0 %vm391_vm1, %v343_v26  ;;  %1613 = vmatmul.mubr.msk.f32.gmra.mxu1 %vm391_vm1, %v343_v26 }
  0x34   : > { %522 = vmatprep.mubr.f32.mxu0 %v1939_v1  ;;  %629 = vmatprep.mubr.f32.mxu1 %v1939_v1 }
  0x35   : > { %1036 = vperm.xlu0 %1705, %v1003_v27   ;;  %1031 = vperm.xlu1 %1706, %v1002_v28  }
  0x37   : > { %1605 = vmatmul.mubr.msk.f32.gmra.mxu0 %vm391_vm1, %v344_v29  ;;  %1614 = vmatmul.mubr.msk.f32.gmra.mxu1 %vm391_vm1, %v344_v29 }
  0x38   : > { %812 = vmatprep.mubr.f32.mxu0 %v1939_v1  ;;  %919 = vmatprep.mubr.f32.mxu1 %v1939_v1 }
  0x39   : > { %1026 = vperm.xlu0 %1705, %v1001_v30   ;;  %1021 = vperm.xlu1 %1706, %v1000_v31  }
  0x3d   : > { %1016 = vperm.xlu0 %1705, %v999_v32   ;;  %1011 = vperm.xlu1 %1706, %v998_v33  }
  0x41   : > { %1006 = vperm.xlu0 %1705, %v997_v34   ;;  %1318 = vperm.xlu1 %1706, %v1315_v35  }
  0x94   : > { %v385_v36 = vpop.permute.xlu0 %384  ;;  %v2166_v40 = vpop.permute.xlu1 %374 }
  0x98   : > { %v2162_v37 = vpop.permute.xlu0 %379  ;;  %v2176_v48 = vpop.permute.xlu1 %369 }
  0x9c   : > { %v2172_v45 = vpop.permute.xlu0 %364  ;;  %v2185_v57 = vpop.permute.xlu1 %359 }
  0xa0   : > { %v2182_v53 = vpop.permute.xlu0 %354 }
  0xdf   : > { %v488_v38 = vpop.f32.mrf.mxu0  ;;  %v2164_v39 = vpop.f32.mrf.mxu1 }
  0xe0   : > { %v489_v54 = vadd.f32 %v488_v38, %v2182_v53 }
  0xe1   : > { %v490_v41 = vpop.f32.mrf.mxu0  ;;  %v2168_v42 = vpop.f32.mrf.mxu1 }
  0xe2   : > { %v491_v58 = vadd.f32 %v490_v41, %v2182_v53  ;;  %1709 = vtanh.f32 %v489_v54 }
  0xe3   : > { %v494_v43 = vpop.f32.mrf.mxu0  ;;  %v2170_v44 = vpop.f32.mrf.mxu1 }
  0xe4   : > { %v495_v59 = vadd.f32 %v494_v43, %v2185_v57  ;;  %1711 = vtanh.f32 %v491_v58 }
  0xe5   : > { %v496_v46 = vpop.f32.mrf.mxu0  ;;  %v2174_v47 = vpop.f32.mrf.mxu1 }
  0xe6   : > { %v497_v62 = vadd.f32 %v496_v46, %v2185_v57  ;;  %1713 = vtanh.f32 %v495_v59  ;;  %v604_v41 = vadd.f32 %v2174_v47, %v2185_v57  ;;  %v602_v46 = vadd.f32 %v2170_v44, %v2185_v57 }
  0xe7   : > { %v500_v49 = vpop.f32.mrf.mxu0  ;;  %v2178_v50 = vpop.f32.mrf.mxu1 }
  0xe8   : > { %v501_v63 = vadd.f32 %v500_v49, %v2172_v45  ;;  %1715 = vtanh.f32 %v497_v62  ;;  %v608_v38 = vadd.f32 %v2178_v50, %v2172_v45  ;;  %v598_v49 = vadd.f32 %v2168_v42, %v2182_v53  ;;  %v664_v62 = vld [vmem:[%s2515_s3] sm:$0xff] }
  0xe9   : > { %v502_v51 = vpop.f32.mrf.mxu0  ;;  %v2180_v52 = vpop.f32.mrf.mxu1 }
  0xea   : > { %v503_v3 = vadd.f32 %v502_v51, %v2172_v45  ;;  %1717 = vtanh.f32 %v501_v63 }
  0xeb   : > { %v506_v55 = vpop.f32.mrf.mxu0  ;;  %v613_v56 = vpop.f32.mrf.mxu1 }
  0xec   : > { %v507_v4 = vadd.f32 %v506_v55, %v2176_v48  ;;  %1719 = vtanh.f32 %v503_v3  ;;  %v614_v34 = vadd.f32 %v613_v56, %v2176_v48  ;;  %v666_v3 = vld [vmem:[%s2515_s3 + $0x10] sm:$0xff] }
  0xed   : > { %v508_v60 = vpop.f32.mrf.mxu0  ;;  %v615_v61 = vpop.f32.mrf.mxu1 }
  0xee   : > { %v509_v7 = vadd.f32 %v508_v60, %v2176_v48  ;;  %1721 = vtanh.f32 %v507_v4  ;;  %v616_v32 = vadd.f32 %v615_v61, %v2176_v48  ;;  %v667_v4 = vld [vmem:[%s2515_s3 + $0x18] sm:$0xff] }
  0xef   : > { %v512_v0 = vpop.f32.mrf.mxu0  ;;  %v619_v2 = vpop.f32.mrf.mxu1 }
  0xf0   : > { %v513_v8 = vadd.f32 %v512_v0, %v2166_v40  ;;  %1723 = vtanh.f32 %v509_v7  ;;  %v2199_v25 = vpop.eup %1709  ;;  %v620_v30 = vadd.f32 %v619_v2, %v2166_v40  ;;  %v665_v2 = vld [vmem:[%s2515_s3 + $0x8] sm:$0xff]  ;;  %v670_v7 = vld [vmem:[%s2515_s3 + $0x30] sm:$0x3] }
  0xf1   : > { %v514_v5 = vpop.f32.mrf.mxu0  ;;  %v621_v6 = vpop.f32.mrf.mxu1 }
  0xf2   : > { %v515_v11 = vadd.f32 %v514_v5, %v2166_v40  ;;  %1725 = vtanh.f32 %v513_v8  ;;  %v2202_v27 = vpop.eup %1711  ;;  %v622_v28 = vadd.f32 %v621_v6, %v2166_v40  ;;  %v668_v5 = vld [vmem:[%s2515_s3 + $0x20] sm:$0xff]  ;;  %v669_v6 = vld [vmem:[%s2515_s3 + $0x28] sm:$0xff]  ;;  %v2278_v8 = vpop.permute.xlu1 %710 }
  0xf3   : > { %v518_v9 = vpop.f32.mrf.mxu0  ;;  %v625_v10 = vpop.f32.mrf.mxu1 }
  0xf4   : > { %v519_v12 = vadd.f32 %v518_v9, %v2162_v37  ;;  %1727 = vtanh.f32 %v515_v11  ;;  %v626_v26 = vadd.f32 %v625_v10, %v2162_v37  ;;  %v2205_v29 = vpop.eup %1713  ;;  %v2282_v11 = vpop.permute.xlu0 %705 }
  0xf5   : > { %v520_v13 = vpop.f32.mrf.mxu0  ;;  %v627_v14 = vpop.f32.mrf.mxu1 }
  0xf6   : > { %v521_v15 = vadd.f32 %v520_v13, %v2162_v37  ;;  %1729 = vtanh.f32 %v519_v12  ;;  %v628_v24 = vadd.f32 %v627_v14, %v2162_v37  ;;  %v1716_v31 = vpop.eup %1715  ;;  %v2280_v9 = vpop.permute.xlu1 %700 }
  0xf7   : > { %v524_v16 = vpop.f32.mrf.mxu0  ;;  %v631_v17 = vpop.f32.mrf.mxu1 }
  0xf8   : > { %v525_v18 = vadd.f32 %v524_v16, %v385_v36  ;;  %1731 = vtanh.f32 %v521_v15  ;;  %v632_v21 = vadd.f32 %v631_v17, %v385_v36  ;;  %v1718_v33 = vpop.eup %1717 }
  0xf9   : > { %v526_v19 = vpop.f32.mrf.mxu0  ;;  %v633_v20 = vpop.f32.mrf.mxu1 }
  0xfa   : > { %v527_v22 = vadd.f32 %v526_v19, %v385_v36  ;;  %v634_v23 = vadd.f32 %v633_v20, %v385_v36  ;;  %1733 = vtanh.f32 %v525_v18  ;;  %v1720_v35 = vpop.eup %1719  ;;  %v610_v36 = vadd.f32 %v2180_v52, %v2172_v45  ;;  %v2288_v16 = vpop.permute.xlu1 %690 }
  0xfb   : > { %v1722_v37 = vpop.eup %1721  ;;  %v596_v45 = vadd.f32 %v2164_v39, %v2182_v53  ;;  %v2292_v19 = vpop.permute.xlu0 %695 }
  0xfc   : > { %1735 = vtanh.f32 %v527_v22 }
  0xfd   : > { %1737 = vtanh.f32 %v634_v23  ;;  %v1724_v40 = vpop.eup %1723 }
  0xfe   : > { %1739 = vtanh.f32 %v632_v21 }
  0xff   : > { %1741 = vtanh.f32 %v628_v24  ;;  %v1726_v43 = vpop.eup %1725  ;;  %v2298_v24 = vpop.permute.xlu1 %680 }
 0x100   : > { %1743 = vtanh.f32 %v626_v26 }
 0x101   : > { %1745 = vtanh.f32 %v622_v28  ;;  %v1728_v48 = vpop.eup %1727  ;;  %v2303_v28 = vpop.permute.xlu0 %685 }
 0x102   : > { %1747 = vtanh.f32 %v620_v30 }
 0x103   : > { %1749 = vtanh.f32 %v616_v32  ;;  %v1730_v51 = vpop.eup %1729 }
 0x104   : > { %1751 = vtanh.f32 %v614_v34 }
 0x105   : > { %1753 = vtanh.f32 %v610_v36  ;;  %v1732_v50 = vpop.eup %1731 }
 0x106   : > { %1755 = vtanh.f32 %v608_v38 }
 0x107   : > { %1757 = vtanh.f32 %v604_v41  ;;  %v1734_v47 = vpop.eup %1733 }
 0x108   : > { %1759 = vtanh.f32 %v602_v46 }
 0x109   : > { %v1736_v52 = vpop.eup %1735  ;;  %1761 = vtanh.f32 %v598_v49 }
 0x10a   : > { %v1738_v54 = vpop.eup %1737  ;;  %1763 = vtanh.f32 %v596_v45  ;;  %1615 = vmatprep.subr.msk.mxu0 %vm735_vm2, %v1736_v52 }
 0x10b   : > { %v1740_v44 = vpop.eup %1739  ;;  %1624 = vmatprep.subr.msk.mxu1 %vm735_vm2, %v1738_v54  ;;  %1616 = vmatpush1.msk.msra.mxu0 %vm735_vm2, %v1734_v47 }
 0x10c   : > { %v1742_v42 = vpop.eup %1741  ;;  %1625 = vmatpush1.msk.msra.mxu1 %vm735_vm2, %v1740_v44  ;;  %768 = vmatprep.subr.mxu0 %v1732_v50 }
 0x10d   : > { %v1744_v39 = vpop.eup %1743  ;;  %875 = vmatprep.subr.mxu1 %v1742_v42  ;;  %769 = vmatpush1.msra.mxu0 %v1730_v51 }
 0x10e   : > { %v1746_v53 = vpop.eup %1745  ;;  %876 = vmatpush1.msra.mxu1 %v1744_v39  ;;  %770 = vmatprep.subr.mxu0 %v1728_v48 }
 0x10f   : > { %v1748_v55 = vpop.eup %1747  ;;  %877 = vmatprep.subr.mxu1 %v1746_v53  ;;  %771 = vmatpush1.msra.mxu0 %v1726_v43 }
 0x110   : > { %v1750_v56 = vpop.eup %1749  ;;  %878 = vmatpush1.msra.mxu1 %v1748_v55  ;;  %772 = vmatprep.subr.mxu0 %v1724_v40 }
 0x111   : > { %v1752_v57 = vpop.eup %1751  ;;  %879 = vmatprep.subr.mxu1 %v1750_v56  ;;  %773 = vmatpush1.msra.mxu0 %v1722_v37 }
 0x112   : > { %v1754_v58 = vpop.eup %1753  ;;  %880 = vmatpush1.msra.mxu1 %v1752_v57  ;;  %774 = vmatprep.subr.mxu0 %v1720_v35 }
 0x113   : > { %v1756_v59 = vpop.eup %1755  ;;  %881 = vmatprep.subr.mxu1 %v1754_v58  ;;  %775 = vmatpush1.msra.mxu0 %v1718_v33 }
 0x114   : > { %v1758_v60 = vpop.eup %1757  ;;  %882 = vmatpush1.msra.mxu1 %v1756_v59  ;;  %776 = vmatprep.subr.mxu0 %v1716_v31 }
 0x115   : > { %v1760_v61 = vpop.eup %1759  ;;  %883 = vmatprep.subr.mxu1 %v1758_v60  ;;  %777 = vmatpush1.msra.mxu0 %v2205_v29 }
 0x116   : > { %v1762_v63 = vpop.eup %1761  ;;  %884 = vmatpush1.msra.mxu1 %v1760_v61  ;;  %778 = vmatprep.subr.mxu0 %v2202_v27 }
 0x117   : > { %v1764_v0 = vpop.eup %1763  ;;  %885 = vmatprep.subr.mxu1 %v1762_v63  ;;  %779 = vmatpush1.msra.mxu0 %v2199_v25 }
 0x118   : > { %886 = vmatpush1.msra.mxu1 %v1764_v0  ;;  %1617 = vmatmul.mubr.msk.f32.vlgmr.msra.gmra.mxu0 %vm713_vm3, %v664_v62 }
 0x119   : > { %1626 = vmatmul.mubr.msk.f32.vlgmr.msra.gmra.mxu1 %vm713_vm3, %v664_v62  ;;  %818 = vmatprep.mubr.f32.mxu0 %v1939_v1 }
 0x11a   : > { %925 = vmatprep.mubr.f32.mxu1 %v1939_v1 }
 0x11c   : > { %1618 = vmatmul.mubr.msk.f32.gmra.mxu0 %vm713_vm3, %v665_v2 }
 0x11d   : > { %1627 = vmatmul.mubr.msk.f32.gmra.mxu1 %vm713_vm3, %v665_v2  ;;  %824 = vmatprep.mubr.f32.mxu0 %v1939_v1 }
 0x11e   : > { %931 = vmatprep.mubr.f32.mxu1 %v1939_v1 }
 0x120   : > { %1619 = vmatmul.mubr.msk.f32.gmra.mxu0 %vm713_vm3, %v666_v3 }
 0x121   : > { %1628 = vmatmul.mubr.msk.f32.gmra.mxu1 %vm713_vm3, %v666_v3  ;;  %830 = vmatprep.mubr.f32.mxu0 %v1939_v1 }
 0x122   : > { %937 = vmatprep.mubr.f32.mxu1 %v1939_v1 }
 0x124   : > { %1620 = vmatmul.mubr.msk.f32.gmra.mxu0 %vm713_vm3, %v667_v4 }
 0x125   : > { %1629 = vmatmul.mubr.msk.f32.gmra.mxu1 %vm713_vm3, %v667_v4  ;;  %836 = vmatprep.mubr.f32.mxu0 %v1939_v1 }
 0x126   : > { %943 = vmatprep.mubr.f32.mxu1 %v1939_v1 }
 0x128   : > { %1621 = vmatmul.mubr.msk.f32.gmra.mxu0 %vm713_vm3, %v668_v5 }
 0x129   : > { %1630 = vmatmul.mubr.msk.f32.gmra.mxu1 %vm713_vm3, %v668_v5  ;;  %842 = vmatprep.mubr.f32.mxu0 %v1939_v1 }
 0x12a   : > { %949 = vmatprep.mubr.f32.mxu1 %v1939_v1 }
 0x12c   : > { %1622 = vmatmul.mubr.msk.f32.gmra.mxu0 %vm713_vm3, %v669_v6 }
 0x12d   : > { %1631 = vmatmul.mubr.msk.f32.gmra.mxu1 %vm713_vm3, %v669_v6  ;;  %848 = vmatprep.mubr.f32.mxu0 %v1939_v1 }
 0x12e   : > { %955 = vmatprep.mubr.f32.mxu1 %v1939_v1 }
 0x130   : > { %1623 = vmatmul.mubr.msk.f32.gmra.mxu0 %vm713_vm3, %v670_v7 }
 0x131   : > { %1632 = vmatmul.mubr.msk.f32.gmra.mxu1 %vm713_vm3, %v670_v7  ;;  %1136 = vmatprep.mubr.f32.mxu0 %v1939_v1 }
 0x132   : > { %1243 = vmatprep.mubr.f32.mxu1 %v1939_v1 }
 0x1d8   : > { %v814_v10 = vpop.f32.mrf.mxu0 }
 0x1d9   : > { %v2284_v12 = vpop.f32.mrf.mxu1  ;;  %v815_v26 = vadd.f32 %v814_v10, %v2298_v24 }
 0x1da   : > { %v816_v13 = vpop.f32.mrf.mxu0 }
 0x1db   : > { %v2286_v14 = vpop.f32.mrf.mxu1  ;;  %v817_v29 = vadd.f32 %v816_v13, %v2298_v24  ;;  %1765 = vtanh.f32 %v815_v26 }
 0x1dc   : > { %v820_v15 = vpop.f32.mrf.mxu0 }
 0x1dd   : > { %v2290_v17 = vpop.f32.mrf.mxu1  ;;  %v821_v31 = vadd.f32 %v820_v15, %v2303_v28  ;;  %1767 = vtanh.f32 %v817_v29 }
 0x1de   : > { %v822_v18 = vpop.f32.mrf.mxu0 }
 0x1df   : > { %v2294_v20 = vpop.f32.mrf.mxu1  ;;  %v823_v33 = vadd.f32 %v822_v18, %v2303_v28  ;;  %1769 = vtanh.f32 %v821_v31  ;;  %v928_v18 = vadd.f32 %v2290_v17, %v2303_v28 }
 0x1e0   : > { %v826_v21 = vpop.f32.mrf.mxu0  ;;  %v930_v13 = vadd.f32 %v2294_v20, %v2303_v28 }
 0x1e1   : > { %v2296_v22 = vpop.f32.mrf.mxu1  ;;  %v827_v35 = vadd.f32 %v826_v21, %v2288_v16  ;;  %1771 = vtanh.f32 %v823_v33  ;;  %v924_v21 = vadd.f32 %v2286_v14, %v2298_v24 }
 0x1e2   : > { %v828_v23 = vpop.f32.mrf.mxu0 }
 0x1e3   : > { %v2300_v25 = vpop.f32.mrf.mxu1  ;;  %v829_v37 = vadd.f32 %v828_v23, %v2288_v16  ;;  %1773 = vtanh.f32 %v827_v35 }
 0x1e4   : > { %v832_v27 = vpop.f32.mrf.mxu0 }
 0x1e5   : > { %v939_v30 = vpop.f32.mrf.mxu1  ;;  %v833_v40 = vadd.f32 %v832_v27, %v2292_v19  ;;  %1775 = vtanh.f32 %v829_v37  ;;  %v991_v37 = vld [vmem:[%s2517_s5 + $0x8] sm:$0xff] }
 0x1e6   : > { %v834_v32 = vpop.f32.mrf.mxu0  ;;  %v940_v6 = vadd.f32 %v939_v30, %v2292_v19 }
 0x1e7   : > { %v941_v34 = vpop.f32.mrf.mxu1  ;;  %v835_v43 = vadd.f32 %v834_v32, %v2292_v19  ;;  %1777 = vtanh.f32 %v833_v40  ;;  %v993_v40 = vld [vmem:[%s2517_s5 + $0x18] sm:$0xff] }
 0x1e8   : > { %v838_v36 = vpop.f32.mrf.mxu0  ;;  %v2321_v60 = vpop.eup %1765  ;;  %v942_v4 = vadd.f32 %v941_v34, %v2292_v19  ;;  %v990_v34 = vld [vmem:[%s2517_s5] sm:$0xff] }
 0x1e9   : > { %v945_v38 = vpop.f32.mrf.mxu1  ;;  %v839_v48 = vadd.f32 %v838_v36, %v2280_v9  ;;  %1779 = vtanh.f32 %v835_v43  ;;  %v995_v43 = vld [vmem:[%s2517_s5 + $0x28] sm:$0xff] }
 0x1ea   : > { %v840_v41 = vpop.f32.mrf.mxu0  ;;  %v2324_v62 = vpop.eup %1767  ;;  %v946_v2 = vadd.f32 %v945_v38, %v2280_v9  ;;  %v992_v38 = vld [vmem:[%s2517_s5 + $0x10] sm:$0xff] }
 0x1eb   : > { %v947_v46 = vpop.f32.mrf.mxu1  ;;  %v841_v51 = vadd.f32 %v840_v41, %v2280_v9  ;;  %1781 = vtanh.f32 %v839_v48  ;;  %v994_v41 = vld [vmem:[%s2517_s5 + $0x20] sm:$0xff]  ;;  %v2400_v48 = vpop.permute.xlu0 %1036 }
 0x1ec   : > { %v844_v49 = vpop.f32.mrf.mxu0  ;;  %v948_v63 = vadd.f32 %v947_v46, %v2280_v9  ;;  %v2327_v0 = vpop.eup %1769  ;;  %v996_v46 = vld [vmem:[%s2517_s5 + $0x30] sm:$0x3] }
 0x1ed   : > { %v951_v45 = vpop.f32.mrf.mxu1  ;;  %v845_v50 = vadd.f32 %v844_v49, %v2282_v11  ;;  %1783 = vtanh.f32 %v841_v51 }
 0x1ee   : > { %v846_v47 = vpop.f32.mrf.mxu0  ;;  %v952_v61 = vadd.f32 %v951_v45, %v2282_v11  ;;  %v1772_v3 = vpop.eup %1771 }
 0x1ef   : > { %v847_v52 = vadd.f32 %v846_v47, %v2282_v11  ;;  %v953_v54 = vpop.f32.mrf.mxu1  ;;  %1785 = vtanh.f32 %v845_v50  ;;  %v2402_v49 = vpop.permute.xlu0 %1026 }
 0x1f0   : > { %v850_v44 = vpop.f32.mrf.mxu0  ;;  %v954_v58 = vadd.f32 %v953_v54, %v2282_v11  ;;  %v1774_v5 = vpop.eup %1773  ;;  %v934_v11 = vadd.f32 %v2296_v22, %v2288_v16 }
 0x1f1   : > { %v851_v42 = vadd.f32 %v850_v44, %v2278_v8  ;;  %v957_v39 = vpop.f32.mrf.mxu1  ;;  %1787 = vtanh.f32 %v847_v52  ;;  %v2404_v45 = vpop.permute.xlu1 %1031 }
 0x1f2   : > { %v852_v53 = vpop.f32.mrf.mxu0  ;;  %v958_v55 = vadd.f32 %v957_v39, %v2278_v8  ;;  %v1776_v7 = vpop.eup %1775 }
 0x1f3   : > { %v853_v56 = vadd.f32 %v852_v53, %v2278_v8  ;;  %v959_v57 = vpop.f32.mrf.mxu1  ;;  %1789 = vtanh.f32 %v851_v42  ;;  %v2410_v44 = vpop.permute.xlu0 %1016 }
 0x1f4   : > { %v960_v59 = vadd.f32 %v959_v57, %v2278_v8  ;;  %v936_v8 = vadd.f32 %v2300_v25, %v2288_v16  ;;  %v1778_v10 = vpop.eup %1777  ;;  %v922_v16 = vadd.f32 %v2284_v12, %v2298_v24 }
 0x1f5   : > { %1791 = vtanh.f32 %v853_v56  ;;  %v2414_v53 = vpop.permute.xlu1 %1021 }
 0x1f6   : > { %1793 = vtanh.f32 %v960_v59  ;;  %v1780_v9 = vpop.eup %1779 }
 0x1f7   : > { %1795 = vtanh.f32 %v958_v55 }
 0x1f8   : > { %1797 = vtanh.f32 %v954_v58  ;;  %v1782_v15 = vpop.eup %1781  ;;  %v2420_v58 = vpop.permute.xlu0 %1006 }
 0x1f9   : > { %1799 = vtanh.f32 %v952_v61 }
 0x1fa   : > { %1801 = vtanh.f32 %v948_v63  ;;  %v1784_v19 = vpop.eup %1783 }
 0x1fb   : > { %1803 = vtanh.f32 %v946_v2 }
 0x1fc   : > { %1805 = vtanh.f32 %v942_v4  ;;  %v1786_v23 = vpop.eup %1785 }
 0x1fd   : > { %1807 = vtanh.f32 %v940_v6 }
 0x1fe   : > { %1809 = vtanh.f32 %v936_v8  ;;  %v1788_v22 = vpop.eup %1787 }
 0x1ff   : > { %1811 = vtanh.f32 %v934_v11 }
 0x200   : > { %1813 = vtanh.f32 %v930_v13  ;;  %v1790_v25 = vpop.eup %1789 }
 0x201   : > { %1815 = vtanh.f32 %v928_v18 }
 0x202   : > { %v1792_v20 = vpop.eup %1791  ;;  %1817 = vtanh.f32 %v924_v21 }
 0x203   : > { %v1794_v26 = vpop.eup %1793  ;;  %1819 = vtanh.f32 %v922_v16  ;;  %1633 = vmatprep.subr.msk.mxu0 %vm735_vm2, %v1792_v20 }
 0x204   : > { %v1796_v17 = vpop.eup %1795  ;;  %1642 = vmatprep.subr.msk.mxu1 %vm735_vm2, %v1794_v26  ;;  %1634 = vmatpush1.msk.msra.mxu0 %vm735_vm2, %v1790_v25 }
 0x205   : > { %v1798_v14 = vpop.eup %1797  ;;  %1643 = vmatpush1.msk.msra.mxu1 %vm735_vm2, %v1796_v17  ;;  %1092 = vmatprep.subr.mxu0 %v1788_v22 }
 0x206   : > { %v1800_v12 = vpop.eup %1799  ;;  %1199 = vmatprep.subr.mxu1 %v1798_v14  ;;  %1093 = vmatpush1.msra.mxu0 %v1786_v23 }
 0x207   : > { %v1802_v24 = vpop.eup %1801  ;;  %1200 = vmatpush1.msra.mxu1 %v1800_v12  ;;  %1094 = vmatprep.subr.mxu0 %v1784_v19 }
 0x208   : > { %v1804_v27 = vpop.eup %1803  ;;  %1201 = vmatprep.subr.mxu1 %v1802_v24  ;;  %1095 = vmatpush1.msra.mxu0 %v1782_v15 }
 0x209   : > { %v1806_v28 = vpop.eup %1805  ;;  %1202 = vmatpush1.msra.mxu1 %v1804_v27  ;;  %1096 = vmatprep.subr.mxu0 %v1780_v9 }
 0x20a   : > { %v1808_v29 = vpop.eup %1807  ;;  %1203 = vmatprep.subr.mxu1 %v1806_v28  ;;  %1097 = vmatpush1.msra.mxu0 %v1778_v10 }
 0x20b   : > { %v1810_v30 = vpop.eup %1809  ;;  %1204 = vmatpush1.msra.mxu1 %v1808_v29  ;;  %1098 = vmatprep.subr.mxu0 %v1776_v7 }
 0x20c   : > { %v1812_v31 = vpop.eup %1811  ;;  %1205 = vmatprep.subr.mxu1 %v1810_v30  ;;  %1099 = vmatpush1.msra.mxu0 %v1774_v5 }
 0x20d   : > { %v1814_v32 = vpop.eup %1813  ;;  %1206 = vmatpush1.msra.mxu1 %v1812_v31  ;;  %1100 = vmatprep.subr.mxu0 %v1772_v3 }
 0x20e   : > { %v1816_v33 = vpop.eup %1815  ;;  %1207 = vmatprep.subr.mxu1 %v1814_v32  ;;  %1101 = vmatpush1.msra.mxu0 %v2327_v0 }
 0x20f   : > { %v1818_v35 = vpop.eup %1817  ;;  %1208 = vmatpush1.msra.mxu1 %v1816_v33  ;;  %1102 = vmatprep.subr.mxu0 %v2324_v62  ;;  %v2425_v62 = vpop.permute.xlu1 %1011 }
 0x210   : > { %v1820_v36 = vpop.eup %1819  ;;  %1209 = vmatprep.subr.mxu1 %v1818_v35  ;;  %1103 = vmatpush1.msra.mxu0 %v2321_v60 }
 0x211   : > { %1210 = vmatpush1.msra.mxu1 %v1820_v36  ;;  %1635 = vmatmul.mubr.msk.f32.vlgmr.msra.gmra.mxu0 %vm713_vm3, %v990_v34 }
 0x212   : > { %1644 = vmatmul.mubr.msk.f32.vlgmr.msra.gmra.mxu1 %vm713_vm3, %v990_v34  ;;  %1142 = vmatprep.mubr.f32.mxu0 %v1939_v1 }
 0x213   : > { %1249 = vmatprep.mubr.f32.mxu1 %v1939_v1 }
 0x215   : > { %1636 = vmatmul.mubr.msk.f32.gmra.mxu0 %vm713_vm3, %v991_v37 }
 0x216   : > { %1645 = vmatmul.mubr.msk.f32.gmra.mxu1 %vm713_vm3, %v991_v37  ;;  %1148 = vmatprep.mubr.f32.mxu0 %v1939_v1 }
 0x217   : > { %1255 = vmatprep.mubr.f32.mxu1 %v1939_v1 }
 0x219   : > { %1637 = vmatmul.mubr.msk.f32.gmra.mxu0 %vm713_vm3, %v992_v38 }
 0x21a   : > { %1646 = vmatmul.mubr.msk.f32.gmra.mxu1 %vm713_vm3, %v992_v38  ;;  %1154 = vmatprep.mubr.f32.mxu0 %v1939_v1 }
 0x21b   : > { %1261 = vmatprep.mubr.f32.mxu1 %v1939_v1 }
 0x21d   : > { %1638 = vmatmul.mubr.msk.f32.gmra.mxu0 %vm713_vm3, %v993_v40 }
 0x21e   : > { %1647 = vmatmul.mubr.msk.f32.gmra.mxu1 %vm713_vm3, %v993_v40  ;;  %1160 = vmatprep.mubr.f32.mxu0 %v1939_v1 }
 0x21f   : > { %1267 = vmatprep.mubr.f32.mxu1 %v1939_v1 }
 0x221   : > { %1639 = vmatmul.mubr.msk.f32.gmra.mxu0 %vm713_vm3, %v994_v41 }
 0x222   : > { %1648 = vmatmul.mubr.msk.f32.gmra.mxu1 %vm713_vm3, %v994_v41  ;;  %1166 = vmatprep.mubr.f32.mxu0 %v1939_v1 }
 0x223   : > { %1273 = vmatprep.mubr.f32.mxu1 %v1939_v1 }
 0x225   : > { %1640 = vmatmul.mubr.msk.f32.gmra.mxu0 %vm713_vm3, %v995_v43 }
 0x226   : > { %1649 = vmatmul.mubr.msk.f32.gmra.mxu1 %vm713_vm3, %v995_v43  ;;  %1172 = vmatprep.mubr.f32.mxu0 %v1939_v1 }
 0x227   : > { %1279 = vmatprep.mubr.f32.mxu1 %v1939_v1 }
 0x229   : > { %1641 = vmatmul.mubr.msk.f32.gmra.mxu0 %vm713_vm3, %v996_v46 }
 0x22a   : > { %1650 = vmatmul.mubr.msk.f32.gmra.mxu1 %vm713_vm3, %v996_v46  ;;  %1404 = vmatprep.mubr.f32.mxu0 %v1939_v1 }
 0x22b   : > { %1475 = vmatprep.mubr.f32.mxu1 %v1939_v1 }
 0x2d1   : > { %v1138_v51 = vpop.f32.mrf.mxu0 }
 0x2d2   : > { %v2406_v50 = vpop.f32.mrf.mxu1  ;;  %v1139_v60 = vadd.f32 %v1138_v51, %v2420_v58 }
 0x2d3   : > { %v1140_v47 = vpop.f32.mrf.mxu0 }
 0x2d4   : > { %v2408_v52 = vpop.f32.mrf.mxu1  ;;  %v1141_v63 = vadd.f32 %v1140_v47, %v2420_v58  ;;  %1821 = vtanh.f32 %v1139_v60 }
 0x2d5   : > { %v1144_v54 = vpop.f32.mrf.mxu0 }
 0x2d6   : > { %v2412_v42 = vpop.f32.mrf.mxu1  ;;  %v1145_v2 = vadd.f32 %v1144_v54, %v2425_v62  ;;  %1823 = vtanh.f32 %v1141_v63 }
 0x2d7   : > { %v1146_v39 = vpop.f32.mrf.mxu0  ;;  %v1252_v54 = vadd.f32 %v2412_v42, %v2425_v62 }
 0x2d8   : > { %v2416_v1 = vpop.f32.mrf.mxu1  ;;  %v1147_v4 = vadd.f32 %v1146_v39, %v2425_v62  ;;  %1825 = vtanh.f32 %v1145_v2 }
 0x2d9   : > { %v1150_v55 = vpop.f32.mrf.mxu0 }
 0x2da   : > { %v2418_v56 = vpop.f32.mrf.mxu1  ;;  %v1151_v6 = vadd.f32 %v1150_v55, %v2410_v44  ;;  %1827 = vtanh.f32 %v1147_v4  ;;  %v1314_v4 = vld [vmem:[%s2519_s7] sm:$0x1] }
 0x2db   : > { %v1152_v57 = vpop.f32.mrf.mxu0  ;;  %v1258_v51 = vadd.f32 %v2418_v56, %v2410_v44 }
 0x2dc   : > { %v2422_v59 = vpop.f32.mrf.mxu1  ;;  %v1153_v8 = vadd.f32 %v1152_v57, %v2410_v44  ;;  %1829 = vtanh.f32 %v1151_v6 }
 0x2dd   : > { %v1156_v61 = vpop.f32.mrf.mxu0  ;;  %v1260_v46 = vadd.f32 %v2422_v59, %v2410_v44  ;;  %v1246_v44 = vadd.f32 %v2406_v50, %v2420_v58 }
 0x2de   : > { %v1263_v0 = vpop.f32.mrf.mxu1  ;;  %v1157_v11 = vadd.f32 %v1156_v61, %v2414_v53  ;;  %1831 = vtanh.f32 %v1153_v8 }
 0x2df   : > { %v1158_v3 = vpop.f32.mrf.mxu0  ;;  %v1264_v41 = vadd.f32 %v1263_v0, %v2414_v53 }
 0x2e0   : > { %v1265_v5 = vpop.f32.mrf.mxu1  ;;  %v1159_v13 = vadd.f32 %v1158_v3, %v2414_v53  ;;  %1833 = vtanh.f32 %v1157_v11 }
 0x2e1   : > { %v1162_v7 = vpop.f32.mrf.mxu0  ;;  %v2443_v31 = vpop.eup %1821  ;;  %v1266_v38 = vadd.f32 %v1265_v5, %v2414_v53  ;;  %v1248_v53 = vadd.f32 %v2408_v52, %v2420_v58 }
 0x2e2   : > { %v1269_v10 = vpop.f32.mrf.mxu1  ;;  %v1163_v18 = vadd.f32 %v1162_v7, %v2402_v49  ;;  %1835 = vtanh.f32 %v1159_v13  ;;  %v1321_v7 = vlaneseq  ;;  %v1319_v13 = vpop.permute.xlu1 %1318 }
 0x2e3   : > { %v1164_v9 = vpop.f32.mrf.mxu0  ;;  %v2446_v33 = vpop.eup %1823  ;;  %v1270_v36 = vadd.f32 %v1269_v10, %v2402_v49  ;;  %v1941_v10 = vmov 1966171168  }
 0x2e4   : > { %v1271_v15 = vpop.f32.mrf.mxu1  ;;  %v1165_v21 = vadd.f32 %v1164_v9, %v2402_v49  ;;  %1837 = vtanh.f32 %v1163_v18  ;;  %v1322_v8 = vshrl.u32 %v1321_v7, 7  ;;  %v1489_v11 = vunpack.c.l.s4 %v1941_v10 }
 0x2e5   : > { %v1168_v19 = vpop.f32.mrf.mxu0  ;;  %v1272_v34 = vadd.f32 %v1271_v15, %v2402_v49  ;;  %v2449_v35 = vpop.eup %1825  ;;  %vm1513_vm4 = vcmp.lt.s32.totalorder %v1321_v7, 512 }
 0x2e6   : > { %v1275_v23 = vpop.f32.mrf.mxu1  ;;  %v1169_v16 = vadd.f32 %v1168_v19, %v2404_v45  ;;  %1839 = vtanh.f32 %v1165_v21  ;;  %v1323_v9 = vsub.s32 0, %v1322_v8  ;;  %v1490_v15 = vunpack.c.0.s8 %v1489_v11 }
 0x2e7   : > { %v1170_v22 = vpop.f32.mrf.mxu0  ;;  %v1276_v32 = vadd.f32 %v1275_v23, %v2404_v45  ;;  %v1828_v37 = vpop.eup %1827 }
 0x2e8   : > { %v1171_v25 = vadd.f32 %v1170_v22, %v2404_v45  ;;  %v1277_v20 = vpop.f32.mrf.mxu1  ;;  %1841 = vtanh.f32 %v1169_v16  ;;  %v1324_v19 = vrot.slane %v1319_v13, %v1323_v9  ;;  %v1493_v16 = vsub.s32 %v1490_v15, %v1322_v8 }
 0x2e9   : > { %v1174_v26 = vpop.f32.mrf.mxu0  ;;  %v1278_v29 = vadd.f32 %v1277_v20, %v2404_v45  ;;  %v1830_v40 = vpop.eup %1829  ;;  %v1254_v45 = vadd.f32 %v2416_v1, %v2425_v62 }
 0x2ea   : > { %v1175_v17 = vadd.f32 %v1174_v26, %v2400_v48  ;;  %v1281_v14 = vpop.f32.mrf.mxu1  ;;  %1843 = vtanh.f32 %v1171_v25 }
 0x2eb   : > { %v1176_v12 = vpop.f32.mrf.mxu0  ;;  %v1282_v24 = vadd.f32 %v1281_v14, %v2400_v48  ;;  %v1832_v43 = vpop.eup %1831 }
 0x2ec   : > { %v1177_v27 = vadd.f32 %v1176_v12, %v2400_v48  ;;  %v1283_v28 = vpop.f32.mrf.mxu1  ;;  %1845 = vtanh.f32 %v1175_v17 }
 0x2ed   : > { %v1284_v30 = vadd.f32 %v1283_v28, %v2400_v48  ;;  %v1834_v48 = vpop.eup %1833 }
 0x2ee   : > { %1847 = vtanh.f32 %v1177_v27 }
 0x2ef   : > { %1849 = vtanh.f32 %v1284_v30  ;;  %v1836_v49 = vpop.eup %1835 }
 0x2f0   : > { %1851 = vtanh.f32 %v1282_v24 }
 0x2f1   : > { %1853 = vtanh.f32 %v1278_v29  ;;  %v1838_v47 = vpop.eup %1837 }
 0x2f2   : > { %1855 = vtanh.f32 %v1276_v32 }
 0x2f3   : > { %1857 = vtanh.f32 %v1272_v34  ;;  %v1840_v39 = vpop.eup %1839 }
 0x2f4   : > { %1859 = vtanh.f32 %v1270_v36 }
 0x2f5   : > { %1861 = vtanh.f32 %v1266_v38  ;;  %v1842_v55 = vpop.eup %1841 }
 0x2f6   : > { %1863 = vtanh.f32 %v1264_v41 }
 0x2f7   : > { %1865 = vtanh.f32 %v1260_v46  ;;  %v1844_v56 = vpop.eup %1843 }
 0x2f8   : > { %1867 = vtanh.f32 %v1258_v51 }
 0x2f9   : > { %1869 = vtanh.f32 %v1254_v45  ;;  %v1846_v57 = vpop.eup %1845 }
 0x2fa   : > { %1871 = vtanh.f32 %v1252_v54 }
 0x2fb   : > { %v1848_v1 = vpop.eup %1847  ;;  %1873 = vtanh.f32 %v1248_v53 }
 0x2fc   : > { %v1850_v59 = vpop.eup %1849  ;;  %1875 = vtanh.f32 %v1246_v44  ;;  %1651 = vmatprep.subr.msk.mxu0 %vm735_vm2, %v1848_v1 }
 0x2fd   : > { %v1852_v42 = vpop.eup %1851  ;;  %1654 = vmatprep.subr.msk.mxu1 %vm735_vm2, %v1850_v59  ;;  %1652 = vmatpush1.msk.msra.mxu0 %vm735_vm2, %v1846_v57 }
 0x2fe   : > { %v1854_v52 = vpop.eup %1853  ;;  %1655 = vmatpush1.msk.msra.mxu1 %vm735_vm2, %v1852_v42  ;;  %1360 = vmatprep.subr.mxu0 %v1844_v56 }
 0x2ff   : > { %v1856_v50 = vpop.eup %1855  ;;  %1431 = vmatprep.subr.mxu1 %v1854_v52  ;;  %1361 = vmatpush1.msra.mxu0 %v1842_v55 }
 0x300   : > { %v1858_v58 = vpop.eup %1857  ;;  %1432 = vmatpush1.msra.mxu1 %v1856_v50  ;;  %1362 = vmatprep.subr.mxu0 %v1840_v39 }
 0x301   : > { %v1860_v60 = vpop.eup %1859  ;;  %1433 = vmatprep.subr.mxu1 %v1858_v58  ;;  %1363 = vmatpush1.msra.mxu0 %v1838_v47 }
 0x302   : > { %v1862_v61 = vpop.eup %1861  ;;  %1434 = vmatpush1.msra.mxu1 %v1860_v60  ;;  %1364 = vmatprep.subr.mxu0 %v1836_v49 }
 0x303   : > { %v1864_v62 = vpop.eup %1863  ;;  %1435 = vmatprep.subr.mxu1 %v1862_v61  ;;  %1365 = vmatpush1.msra.mxu0 %v1834_v48 }
 0x304   : > { %v1866_v63 = vpop.eup %1865  ;;  %1436 = vmatpush1.msra.mxu1 %v1864_v62  ;;  %1366 = vmatprep.subr.mxu0 %v1832_v43 }
 0x305   : > { %v1868_v0 = vpop.eup %1867  ;;  %1437 = vmatprep.subr.mxu1 %v1866_v63  ;;  %1367 = vmatpush1.msra.mxu0 %v1830_v40 }
 0x306   : > { %v1870_v2 = vpop.eup %1869  ;;  %1438 = vmatpush1.msra.mxu1 %v1868_v0  ;;  %1368 = vmatprep.subr.mxu0 %v1828_v37 }
 0x307   : > { %v1872_v3 = vpop.eup %1871  ;;  %1439 = vmatprep.subr.mxu1 %v1870_v2  ;;  %1369 = vmatpush1.msra.mxu0 %v2449_v35 }
 0x308   : > { %v1874_v5 = vpop.eup %1873  ;;  %1440 = vmatpush1.msra.mxu1 %v1872_v3  ;;  %1370 = vmatprep.subr.mxu0 %v2446_v33 }
 0x309   : > { %v1876_v6 = vpop.eup %1875  ;;  %1441 = vmatprep.subr.mxu1 %v1874_v5  ;;  %1371 = vmatpush1.msra.mxu0 %v2443_v31 }
 0x30a   : > { %1442 = vmatpush1.msra.mxu1 %v1876_v6  ;;  %1653 = vmatmul.mubr.msk.f32.vlgmr.msra.gmra.mxu0 %vm713_vm3, %v1314_v4 }
 0x30b   : > { %1656 = vmatmul.mubr.msk.f32.vlgmr.msra.gmra.mxu1 %vm713_vm3, %v1314_v4 }
 0x3ca   : > { %v1406_v18 = vpop.f32.mrf.mxu0 }
 0x3cb   : > { %v1477_v21 = vpop.f32.mrf.mxu1  ;;  %v1407_v22 = vadd.f32 %v1406_v18, %v1324_v19 }
 0x3cc   : > { %v1408_v23 = vpop.f32.mrf.mxu0  ;;  %v1478_v26 = vadd.f32 %v1477_v21, %v1324_v19 }
 0x3cd   : > { %v1409_v25 = vadd.f32 %v1408_v23, %v1324_v19  ;;  %v1479_v20 = vpop.f32.mrf.mxu1 }
 0x3ce   : > { %v1480_v17 = vadd.f32 %v1479_v20, %v1324_v19 }
 0x3cf   : > { %v1486_v14 = vcombine.low %v1407_v22, %v1409_v25 }
 0x3d0   : > { %v1487_v12 = vcombine.low %v1478_v26, %v1480_v17 }
 0x3d1   : > { %v1494_v24 = vrot.slane %v1486_v14, %v1493_v16 }
 0x3d2   : > { %v1501_v27 = vrot.slane %v1487_v12, %v1493_v16 }
 0x3d4   : > { %v1502_v28 = vcombine.low %v1494_v24, %v1501_v27 }
 0x3d6   : > { %v1509_v29 = vrot.slane %v1502_v28, %v1493_v16 }
 0x3d8   : > { %1515 = vst.msk [vmem:[%s328_s25] sm:$0xf] %vm1513_vm4, %v1509_v29 }
 0x3d9   : > { %1890 = shalt.err (!%p1887_p3)
}
 0x3da   : > { %s1891_s18 = scalar_lea.hbm %s1529_s29, 64  ;;  %s1895_s22 = scalar_lea.hbm %s2521_s9, 128 }
 0x3db   : > { %p1892_p4 = scmp.ne.s32.totalorder %s1529_s29, %s1891_s18  ;;  %p1896_p9 = scmp.lt.s32.totalorder %s1529_s29, %s2521_s9 }
 0x3dc   : > { %p1897_p10 = scmp.lt.s32.totalorder %s1895_s22, %s1891_s18 }
 0x3dd   : > { %p1893_p7 = pnand %p1892_p4, %p2034_p5 }
 0x3de   : > { %p1898_p11 = por %p1897_p10, %p1896_p9 }
 0x3df   : > { %p1894_p8 = pneg %p1893_p7 }
 0x3e1   : > { %p1899_p12 = pnand %p1898_p11, %p1894_p8 }
 0x3e3   : > { %1902 = shalt.err (!%p1899_p12)
}
 0x3e4   : > { %1663 = dma.vmem_to_hbm [thread:$0]  (%p2034_p5), %s1532_s26, 64, %s1529_s29, %s1517_s30  }
 0x3e5 PF: > { %p1669_p13 = scmp.ge.s32.totalorder %s1937_s14, 2  ;;  %s1543_s28 = sand.u32 1, %s1925_s11  }
 0x3e6   : > { %s1544_s10 = scalar_lea.sflag [#allocation4], %s1543_s28 }
 0x3e7   : > { %p1666_p0 = pnand %p1669_p13, %p2038_p6 }
 0x3e9   : > { %p1667_p1 = pneg %p1666_p0 }
 0x3eb   : > { %1920 = dma.done.wait (%p1667_p1), %s1544_s10, 64  }
 0x3ec   : > { %1922 = vsyncadd (%p1667_p1), %s1544_s10, 4294967232  ;;  %p21_p2 = scmp.ge.s32.totalorder %s2021_s16, 4   ;;  %s2524_s11 = smov %s1929_s12 }
 0x3ed   : > { %s2525_s12 = smov %s1933_s13  ;;  %s2526_s13 = smov %s2032_s19 }
 0x3ee   : > { %s2527_s14 = smov %s2021_s16  ;;  %23 = sbr.rel (!%p21_p2) target bundleno = 6 (0x6), region = 91 }
 0x3f3   :  { %1549 = vsyncpa [#allocation4], 1 }
 0x3f4   :  { %1551 = vsyncpa [#allocation4 + $0x1], 1 }

</bundles_post_ra>
